<compile_context>
chip_gen: v7x
topology: tpu7x:2x2x1
jax: 0.10.0
libtpu: 0.0.40
codegen_flags: <defaults>
</compile_context>

<pallas_src>
import jax
import jax.numpy as jnp
from jax.experimental import pallas as pl
from jax.experimental.pallas import tpu as pltpu


def _round_up(n, m):
    return ((n + m - 1) // m) * m


def _linear_kernel(x_ref, w_ref, b_ref, o_ref):
    # x_ref: (TB, D), w_ref: (O, D), b_ref: (1, O), o_ref: (TB, O)
    acc = jax.lax.dot_general(
        x_ref[...],
        w_ref[...],
        dimension_numbers=(((1,), (1,)), ((), ())),  # NT: contract on D
        preferred_element_type=jnp.float32,
    )
    o_ref[...] = (acc + b_ref[...]).astype(o_ref.dtype)


def linear_classifier(x, weight, bias, *, batch_tile=None):
    """x: (B, D) f32; weight: (O, D) f32 (native PyTorch layout); bias: (O,) f32."""
    B, D = x.shape
    O = weight.shape[0]

    # Batch tile: multiple of 8 (sublane), capped at 1024 rows so the
    # double-buffered x stream fits every generation's default scoped VMEM
    # (v5e 16 MiB / v6e 32 MiB / v7x 32 MiB-of-64 MiB).
    if batch_tile is None:
        batch_tile = min(1024, _round_up(B, 8))
    tb = batch_tile

    # Pad batch to a multiple of the tile so every block is full.
    Bp = _round_up(B, tb)
    if Bp != B:
        x = jnp.pad(x, ((0, Bp - B), (0, 0)))

    b2 = bias.reshape(1, O)

    itemsize = jnp.dtype(x.dtype).itemsize
    cost = pl.CostEstimate(
        flops=2 * Bp * D * O,
        transcendentals=0,
        bytes_accessed=(Bp * D + O * D + O + Bp * O) * itemsize,
    )

    out = pl.pallas_call(
        _linear_kernel,
        out_shape=jax.ShapeDtypeStruct((Bp, O), x.dtype),
        grid_spec=pl.GridSpec(
            grid=(Bp // tb,),
            in_specs=[
                pl.BlockSpec((tb, D), lambda i: (i, 0)),   # x: streamed per tile
                pl.BlockSpec((O, D), lambda i: (0, 0)),    # weight: VMEM-resident
                pl.BlockSpec((1, O), lambda i: (0, 0)),    # bias: VMEM-resident
            ],
            out_specs=pl.BlockSpec((tb, O), lambda i: (i, 0)),
        ),
        compiler_params=pltpu.CompilerParams(
            dimension_semantics=("parallel",),
        ),
        cost_estimate=cost,
    )(x, weight, b2)

    return out[:B] if Bp != B else out


if __name__ == "__main__":
    input_dim = 1024
    output_dim = 2
    batch = 8

    key = jax.random.PRNGKey(0)
    kx, kw, kb = jax.random.split(key, 3)

    # Deterministic synthetic params (nn.Linear(input_dim, output_dim) shapes)
    bound = 1.0 / (input_dim ** 0.5)
    weight = jax.random.uniform(kw, (output_dim, input_dim), jnp.float32, -bound, bound)
    bias = jax.random.uniform(kb, (output_dim,), jnp.float32, -bound, bound)
    x = jax.random.normal(kx, (batch, input_dim), jnp.float32)

    out = linear_classifier(x, weight, bias)
    jax.block_until_ready(out)

    # Reference check against plain JAX
    ref = x @ weight.T + bias
    assert out.shape == (batch, output_dim)
    assert jnp.allclose(out, ref, atol=1e-5, rtol=1e-5), "mismatch vs reference"
    print("KERNEL_OK")
</pallas_src>

<mosaic_0001>
module attributes {stable_mosaic.version = 11 : i64} {
  func.func @_linear_kernel(%arg0: i32, %arg1: memref<8x1024xf32, #tpu.memory_space<vmem>>, %arg2: memref<2x1024xf32, #tpu.memory_space<vmem>>, %arg3: memref<1x2xf32, #tpu.memory_space<vmem>>, %arg4: memref<8x2xf32, #tpu.memory_space<vmem>>) attributes {dimension_semantics = [#tpu.dimension_semantics<parallel>], iteration_bounds = array<i64: 1>, scalar_prefetch = 0 : i64, scratch_operands = 0 : i64, tpu.core_type = #tpu.core_type<tc>, window_params = [{transform_indices = @transform_0, window_bounds = array<i64: 8, 1024>}, {pipeline_mode = #tpu.pipeline_mode<synchronous>, transform_indices = @transform_1, window_bounds = array<i64: 2, 1024>}, {pipeline_mode = #tpu.pipeline_mode<synchronous>, transform_indices = @transform_2, window_bounds = array<i64: 1, 2>}, {transform_indices = @transform_3, window_bounds = array<i64: 8, 2>}]} {
    %c0 = arith.constant 0 : index
    %c0_0 = arith.constant 0 : index
    %0 = vector.load %arg1[%c0, %c0_0] : memref<8x1024xf32, #tpu.memory_space<vmem>>, vector<8x1024xf32>
    %c0_1 = arith.constant 0 : index
    %c0_2 = arith.constant 0 : index
    %1 = vector.load %arg2[%c0_1, %c0_2] : memref<2x1024xf32, #tpu.memory_space<vmem>>, vector<2x1024xf32>
    %cst = arith.constant dense<0.000000e+00> : vector<8x2xf32>
    %2 = tpu.matmul %0, %1, %cst {dimension_numbers = #tpu.dot_dimension_numbers<[1], [1], [0], [0], [0, 0, 1, 0], [], []>} : vector<8x1024xf32>, vector<2x1024xf32>, vector<8x2xf32> -> vector<8x2xf32>
    %c0_3 = arith.constant 0 : index
    %c0_4 = arith.constant 0 : index
    %3 = vector.load %arg3[%c0_3, %c0_4] : memref<1x2xf32, #tpu.memory_space<vmem>>, vector<1x2xf32>
    %4 = vector.broadcast %3 : vector<1x2xf32> to vector<8x2xf32>
    %5 = arith.addf %2, %4 : vector<8x2xf32>
    %c0_5 = arith.constant 0 : index
    %c0_6 = arith.constant 0 : index
    %6 = vector.load %arg4[%c0_5, %c0_6] : memref<8x2xf32, #tpu.memory_space<vmem>>, vector<8x2xf32>
    tpu.vector_store %arg4[%c0_5, %c0_6], %5 {strides = array<i32>} : memref<8x2xf32, #tpu.memory_space<vmem>>, vector<8x2xf32>,
    return
  }
  func.func @transform_0(%arg0: i32) -> (i32, i32) {
    %c0_i32 = arith.constant 0 : i32
    %c0_i32_0 = arith.constant 0 : i32
    return %arg0, %c0_i32 : i32, i32
  }
  func.func @transform_1(%arg0: i32) -> (i32, i32) {
    %c0_i32 = arith.constant 0 : i32
    %c0_i32_0 = arith.constant 0 : i32
    %c0_i32_1 = arith.constant 0 : i32
    return %c0_i32, %c0_i32_0 : i32, i32
  }
  func.func @transform_2(%arg0: i32) -> (i32, i32) {
    %c0_i32 = arith.constant 0 : i32
    %c0_i32_0 = arith.constant 0 : i32
    %c0_i32_1 = arith.constant 0 : i32
    return %c0_i32, %c0_i32_0 : i32, i32
  }
  func.func @transform_3(%arg0: i32) -> (i32, i32) {
    %c0_i32 = arith.constant 0 : i32
    %c0_i32_0 = arith.constant 0 : i32
    return %arg0, %c0_i32 : i32, i32
  }
}

</mosaic_0001>

<bundles_post_ra>
// kernel: tpu_custom_call.1
= control target key start
LH: loop header
LB: loop body
LE: loop exit
PB: predicated region body
PF: predicated region fallthrough
CT: control target
= control target key end

     0   :  { %8 = vsyncpa [#allocation3], 0  ;;  %s500_s0 = inlined_call_operand.hbm [shape: f32[8,1024], index: 0, kind: input, shape index: {}]   ;;  %s501_s1 = inlined_call_operand.hbm [shape: f32[2,1024], index: 1, kind: input, shape index: {}]   ;;  %s502_s2 = inlined_call_operand.vmem [shape: f32[1,2], index: 2, kind: input, shape index: {}]   ;;  %s503_s3 = inlined_call_operand.vmem [shape: f32[8,2], index: 3, kind: output, shape index: {}]  }
   0x1   :  { %9 = vsyncpa [#allocation5], 0  ;;  %s447_s12 = smov [#allocation2]   ;;  %s448_s14 = smov [#allocation4]  }
   0x2   :  { %s16_s13 = sshll.u32 %s447_s12, 4  ;;  %s26_s15 = sshll.u32 %s448_s14, 4  ;;  %s17_s13 = int_to_ptr.vmem [resolvable:$true] %s16_s13  ;;  %s27_s15 = int_to_ptr.vmem [resolvable:$true] %s26_s15 }
   0x3   :  { %s399_s18 = scalar_lea.hbm %s500_s0, 1024 }
   0x4   :  { %p400_p0 = scmp.ne.s32.totalorder %s500_s0, %s399_s18  ;;  %p403_p1 = scmp.lt.u32.totalorder %s399_s18, %s500_s0 }
   0x6   :  { %p405_p2 = pnand %p403_p1, %p400_p0 }
   0x8   :  { %408 = shalt.err (!%p405_p2)
}
   0x9   :  { %s409_s23 = scalar_lea.vmem %s17_s13, 1024  ;;  %p414_p4 = scmp.lt.s32.totalorder %s17_s13, %s17_s13 }
   0xa   :  { %p410_p3 = scmp.ne.s32.totalorder %s17_s13, %s409_s23  ;;  %p415_p5 = scmp.lt.s32.totalorder %s409_s23, %s409_s23 }
   0xc   :  { %p416_p6 = por %p415_p5, %p414_p4 }
   0xe   :  { %p417_p7 = pnand %p416_p6, %p410_p3 }
  0x10   :  { %420 = shalt.err (!%p417_p7)
}
  0x11   :  { %19 = dma.hbm_to_vmem [thread:$0]  %s500_s0, 1024, %s17_s13, [#allocation3]  }
  0x12   :  { %s421_s28 = scalar_lea.hbm %s501_s1, 256 }
  0x13   :  { %p422_p8 = scmp.ne.s32.totalorder %s501_s1, %s421_s28  ;;  %p425_p9 = scmp.lt.u32.totalorder %s421_s28, %s501_s1 }
  0x15   :  { %p427_p10 = pnand %p425_p9, %p422_p8 }
  0x17   :  { %430 = shalt.err (!%p427_p10)
}
  0x18   :  { %s431_s6 = scalar_lea.vmem %s27_s15, 256  ;;  %p436_p12 = scmp.lt.s32.totalorder %s27_s15, %s27_s15 }
  0x19   :  { %p432_p11 = scmp.ne.s32.totalorder %s27_s15, %s431_s6  ;;  %p437_p13 = scmp.lt.s32.totalorder %s431_s6, %s431_s6 }
  0x1b   :  { %p438_p0 = por %p437_p13, %p436_p12 }
  0x1d   :  { %p439_p1 = pnand %p438_p0, %p432_p11 }
  0x1f   :  { %442 = shalt.err (!%p439_p1)
}
  0x20   :  { %29 = dma.hbm_to_vmem [thread:$0]  %s501_s1, 256, %s27_s15, [#allocation5]  }
  0x21   :  { %443 = dma.done.wait [#allocation3], 1024  }
  0x22   :  { %444 = vsyncadd [#allocation3], 4294966272 }
  0x23   :  { %445 = dma.done.wait [#allocation5], 256  }
  0x24   :  { %446 = vsyncadd [#allocation5], 4294967040  ;;  %v61_v0 = vlaneseq  ;;  %v449_v1 = vmov 1983009808   ;;  %v46_v6 = vld [vmem:[#allocation4] sm:$0xff]  ;;  %v47_v7 = vld [vmem:[#allocation4 + $0x8] sm:$0xff] }
  0x25   :  { %v59_v2 = vunpack.c.l.s4 %v449_v1  ;;  %v39_v8 = vld [vmem:[#allocation2 + $0x8] sm:$0xff]  ;;  %v57_v9 = vcombine.high %v46_v6, %v46_v6  ;;  %v74_v11 = vcombine.high %v47_v7, %v47_v7  ;;  %v38_v20 = vld [vmem:[#allocation2] sm:$0xff]  ;;  %v41_v22 = vld [vmem:[#allocation2 + $0x18] sm:$0xff]  ;;  %vm379_vm0 = vcmask 15360  }
  0x26   :  { %v62_v3 = vshrl.u32 %v61_v0, 7  ;;  %163 = vmatprep.mubr.f32.mxu1 %v39_v8  ;;  %v43_v13 = vld [vmem:[#allocation2 + $0x28] sm:$0xff]  ;;  %v42_v21 = vld [vmem:[#allocation2 + $0x20] sm:$0xff]  ;;  %v45_v23 = vld [vmem:[#allocation2 + $0x38] sm:$0xff] }
  0x27   :  { %v60_v4 = vunpack.c.0.s8 %v59_v2  ;;  %303 = vmatprep.mubr.f32.mxu0 %v43_v13  ;;  %v40_v24 = vld [vmem:[#allocation2 + $0x10] sm:$0xff]  ;;  %v387_v26 = vld [vmem:[%s502_s2] ss:$0 sm:$0xff] }
  0x28   :  { %v44_v25 = vld [vmem:[#allocation2 + $0x30] sm:$0xff] }
  0x29   :  { %v63_v5 = vsub.s32 %v60_v4, %v62_v3 }
  0x2b   :  { %v64_v10 = vrot.slane %v46_v6, %v63_v5  ;;  %v81_v12 = vrot.slane %v47_v7, %v63_v5  ;;  %v71_v16 = vrot.slane %v57_v9, %v63_v5  ;;  %v88_v17 = vrot.slane %v74_v11, %v63_v5 }
  0x2d   :  { %v72_v14 = vcombine.high %v64_v10, %v64_v10  ;;  %v89_v15 = vcombine.high %v81_v12, %v81_v12  ;;  %v73_v18 = vcombine.high %v71_v16, %v71_v16  ;;  %v90_v19 = vcombine.high %v88_v17, %v88_v17 }
  0x2f   :  { %99 = vmatprep.subr.mxu1 %v72_v14  ;;  %239 = vmatprep.subr.mxu0 %v89_v15 }
  0x30   :  { %100 = vmatpush1.xpose.msra.mxu1 %v64_v10  ;;  %240 = vmatpush1.xpose.msra.mxu0 %v81_v12 }
  0x31   :  { %169 = vmatprep.subr.mxu1 %v73_v18  ;;  %309 = vmatprep.subr.mxu0 %v90_v19 }
  0x33   :  { %164 = vmatmul.mubr.f32.vlgmr.msra.gmra.mrb[0].mxu1 %v38_v20  ;;  %304 = vmatmul.mubr.f32.vlgmr.msra.gmra.mrb[0].mxu0 %v42_v21 }
  0x34   :  { %170 = vmatpush1.xpose.msra.mxu1 %v71_v16  ;;  %310 = vmatpush1.xpose.msra.mxu0 %v88_v17 }
  0x35   :  { %233 = vmatprep.mubr.f32.mxu1 %v41_v22  ;;  %373 = vmatprep.mubr.f32.mxu0 %v45_v23 }
  0x3b   :  { %234 = vmatmul.mubr.f32.vlgmr.msra.gmra.mrb[0].mxu1 %v40_v24  ;;  %374 = vmatmul.mubr.f32.vlgmr.msra.gmra.mrb[0].mxu0 %v44_v25 }
 0x10e   :  { %v235_v27 = vpop.f32.mrb[0].mxu1  ;;  %v375_v28 = vpop.f32.mrb[0].mxu0 }
 0x10f   :  { %v388_v29 = vadd.f32 %v387_v26, %v235_v27  ;;  %v237_v30 = vpop.f32.mrb[1].mxu1  ;;  %v377_v31 = vpop.f32.mrb[1].mxu0 }
 0x111   :  { %v389_v32 = vadd.f32 %v388_v29, %v375_v28 }
 0x113   :  { %380 = vst.msk [vmem:[%s503_s3] sm:$0xff] %vm379_vm0, %v389_v32 }
 0x114   :  { %385 = vsyncpa [#allocation3], 1 }
 0x115   :  { %386 = vsyncpa [#allocation5], 1 }

</bundles_post_ra>
